<compile_context>
chip_gen: v6e
topology: v6e:2x2x1
jax: 0.10.0
libtpu: 0.0.40
codegen_flags: <defaults>
</compile_context>

<pallas_src>
import jax
import jax.numpy as jnp
from jax.experimental import pallas as pl
from jax.experimental.pallas import tpu as pltpu

IN_DIM = 640
H1_PAD = 64    # Linear(640, 50) padded to 64 output columns (zeros inert)
H2_PAD = 32    # Linear(50, 20)  padded to 32 output columns (zeros inert)


def _round_up(n, m):
    return ((n + m - 1) // m) * m


def _mlp_kernel(x_ref, w1_ref, b1_ref, w2_ref, b2_ref, w3_ref, b3_ref, o_ref):
    # GradientReversal is the identity in the forward pass.
    # TODO(synk): training use needs a custom_vjp to reverse gradients (-lambda).
    # Cast to the matmul dtype *inside* the kernel: a wrapper-side astype would
    # add a full extra read+write pass over x in HBM (this kernel is HBM-bound).
    x = x_ref[...].astype(w1_ref.dtype)                                  # (TM, 640)
    h1 = jnp.dot(x, w1_ref[...], preferred_element_type=jnp.float32)    # (TM, 64)
    h1 = jnp.maximum(h1 + b1_ref[...], 0.0)                             # ReLU
    h2 = jnp.dot(h1.astype(w2_ref.dtype), w2_ref[...],
                 preferred_element_type=jnp.float32)                    # (TM, 32)
    h2 = jnp.maximum(h2 + b2_ref[...], 0.0)                             # ReLU
    # Final layer has N=1: VPU multiply + lane reduce, keep the MXU free.
    out = jnp.sum(h2 * w3_ref[...], axis=-1, keepdims=True) + b3_ref[...]
    o_ref[...] = out.astype(o_ref.dtype)


def _prepare_params(params, use_bf16):
    """Pad torch-shaped params to hardware-friendly sizes (zero padding is inert)."""
    w1 = jnp.pad(params["w1"], ((0, 0), (0, H1_PAD - params["w1"].shape[1])))
    b1 = jnp.pad(params["b1"], ((0, 0), (0, H1_PAD - params["b1"].shape[1])))
    w2 = jnp.pad(params["w2"], ((0, H1_PAD - params["w2"].shape[0]),
                                (0, H2_PAD - params["w2"].shape[1])))
    b2 = jnp.pad(params["b2"], ((0, 0), (0, H2_PAD - params["b2"].shape[1])))
    # w3: (20, 1) -> row vector (1, 32) for the VPU reduce.
    w3 = jnp.pad(params["w3"].T, ((0, 0), (0, H2_PAD - params["w3"].shape[0])))
    b3 = params["b3"]                                                    # (1, 1)
    if use_bf16:
        w1 = w1.astype(jnp.bfloat16)
        w2 = w2.astype(jnp.bfloat16)
    return w1, b1, w2, b2, w3, b3


def fc_discriminator_forward(x, params, *, block_rows=2048, use_bf16=True):
    """x: (B, 640) in its producer's dtype (f32 or bf16). Returns (B, 1) float32."""
    B = x.shape[0]
    assert x.shape[1] == IN_DIM, x.shape
    row_align = 8
    # Cap tm near B/2 so there are >=2 grid steps when possible (v7x megacore),
    # and at block_rows so 2 double-buffered f32 tiles fit v5e's 16 MiB scoped
    # VMEM default (2048*640*4 B = 5 MiB per buffer).  Raise block_rows on
    # v6e/v7x (32 MiB scoped default) for slightly better roofline utilization.
    tm = _round_up(min(block_rows, max((B + 1) // 2, row_align)), row_align)
    n_tiles = pl.cdiv(B, tm)        # ragged last block is masked by Pallas

    w1, b1, w2, b2, w3, b3 = _prepare_params(params, use_bf16)
    const = lambda i: (0, 0)        # weights/biases: same block every step (resident)

    flops = 2 * B * (IN_DIM * H1_PAD + H1_PAD * H2_PAD + H2_PAD)
    bytes_accessed = (x.size * x.dtype.itemsize
                      + sum(a.size * a.dtype.itemsize
                            for a in (w1, b1, w2, b2, w3, b3))
                      + B * 4)

    out = pl.pallas_call(
        _mlp_kernel,
        out_shape=jax.ShapeDtypeStruct((B, 1), jnp.float32),
        grid_spec=pltpu.PrefetchScalarGridSpec(
            num_scalar_prefetch=0,
            grid=(n_tiles,),
            in_specs=[
                pl.BlockSpec((tm, IN_DIM), lambda i: (i, 0)),   # x tile
                pl.BlockSpec((IN_DIM, H1_PAD), const),          # w1 (bf16)
                pl.BlockSpec((1, H1_PAD), const),               # b1
                pl.BlockSpec((H1_PAD, H2_PAD), const),          # w2 (bf16)
                pl.BlockSpec((1, H2_PAD), const),               # b2
                pl.BlockSpec((1, H2_PAD), const),               # w3 (row vector)
                pl.BlockSpec((1, 1), const),                    # b3
            ],
            out_specs=pl.BlockSpec((tm, 1), lambda i: (i, 0)),
        ),
        compiler_params=pltpu.CompilerParams(
            dimension_semantics=("parallel",)),
        cost_estimate=pl.CostEstimate(
            flops=flops, transcendentals=0, bytes_accessed=bytes_accessed),
    )(x, w1, b1, w2, b2, w3, b3)
    return out


def init_params(key):
    """Deterministic init mimicking torch.nn.Linear (uniform +/- 1/sqrt(fan_in))."""
    def linear(key, fan_in, fan_out):
        kw, kb = jax.random.split(key)
        bound = 1.0 / jnp.sqrt(float(fan_in))
        w = jax.random.uniform(kw, (fan_in, fan_out), jnp.float32, -bound, bound)
        b = jax.random.uniform(kb, (1, fan_out), jnp.float32, -bound, bound)
        return w, b

    k1, k2, k3 = jax.random.split(key, 3)
    w1, b1 = linear(k1, IN_DIM, 50)
    w2, b2 = linear(k2, 50, 20)
    w3, b3 = linear(k3, 20, 1)
    return {"w1": w1, "b1": b1, "w2": w2, "b2": b2, "w3": w3, "b3": b3}


def _reference(x, p, use_bf16=True):
    """Pure-JAX reference mirroring the kernel's precision choices."""
    cdt = jnp.bfloat16 if use_bf16 else jnp.float32
    h1 = jnp.dot(x.astype(cdt), p["w1"].astype(cdt),
                 preferred_element_type=jnp.float32) + p["b1"]
    h1 = jnp.maximum(h1, 0.0)
    h2 = jnp.dot(h1.astype(cdt), p["w2"].astype(cdt),
                 preferred_element_type=jnp.float32) + p["b2"]
    h2 = jnp.maximum(h2, 0.0)
    return jnp.dot(h2, p["w3"], preferred_element_type=jnp.float32) + p["b3"]


if __name__ == "__main__":
    key = jax.random.PRNGKey(0)
    kx, kx2, kp = jax.random.split(key, 3)
    params = init_params(kp)

    # Small batch (exercises >=2-tile split + ragged, masked last block).
    B = 20
    x = jax.random.normal(kx, (B, IN_DIM), dtype=jnp.float32)
    out_small = jax.block_until_ready(
        fc_discriminator_forward(x, params, block_rows=16))
    out_def = jax.block_until_ready(fc_discriminator_forward(x, params))

    ref = _reference(x, params, use_bf16=True)
    assert out_def.shape == (B, 1), out_def.shape
    assert jnp.allclose(out_small, ref, atol=1e-2, rtol=1e-2), (out_small, ref)
    assert jnp.allclose(out_def, ref, atol=1e-2, rtol=1e-2), (out_def, ref)
    assert jnp.allclose(out_small, out_def, atol=1e-5, rtol=1e-5)

    # Larger batch: default tile selection path with a ragged last block.
    B2 = 200
    x2 = jax.random.normal(kx2, (B2, IN_DIM), dtype=jnp.float32)
    out2 = jax.block_until_ready(fc_discriminator_forward(x2, params))
    ref2 = _reference(x2, params, use_bf16=True)
    assert out2.shape == (B2, 1), out2.shape
    assert jnp.allclose(out2, ref2, atol=1e-2, rtol=1e-2), (out2, ref2)

    print("KERNEL_OK")
</pallas_src>

<mosaic_0001>
module attributes {stable_mosaic.version = 11 : i64} {
  func.func @_mlp_kernel(%arg0: i32, %arg1: memref<16x640xf32, #tpu.memory_space<vmem>>, %arg2: memref<640x64xbf16, #tpu.memory_space<vmem>>, %arg3: memref<1x64xf32, #tpu.memory_space<vmem>>, %arg4: memref<64x32xbf16, #tpu.memory_space<vmem>>, %arg5: memref<1x32xf32, #tpu.memory_space<vmem>>, %arg6: memref<1x32xf32, #tpu.memory_space<vmem>>, %arg7: memref<1x1xf32, #tpu.memory_space<vmem>>, %arg8: memref<16x1xf32, #tpu.memory_space<vmem>>) attributes {dimension_semantics = [#tpu.dimension_semantics<parallel>], iteration_bounds = array<i64: 2>, scalar_prefetch = 0 : i64, scratch_operands = 0 : i64, tpu.core_type = #tpu.core_type<tc>, window_params = [{transform_indices = @transform_0, window_bounds = array<i64: 16, 640>}, {pipeline_mode = #tpu.pipeline_mode<synchronous>, transform_indices = @transform_1, window_bounds = array<i64: 640, 64>}, {pipeline_mode = #tpu.pipeline_mode<synchronous>, transform_indices = @transform_2, window_bounds = array<i64: 1, 64>}, {pipeline_mode = #tpu.pipeline_mode<synchronous>, transform_indices = @transform_3, window_bounds = array<i64: 64, 32>}, {pipeline_mode = #tpu.pipeline_mode<synchronous>, transform_indices = @transform_4, window_bounds = array<i64: 1, 32>}, {pipeline_mode = #tpu.pipeline_mode<synchronous>, transform_indices = @transform_5, window_bounds = array<i64: 1, 32>}, {pipeline_mode = #tpu.pipeline_mode<synchronous>, transform_indices = @transform_6, window_bounds = array<i64: 1, 1>}, {transform_indices = @transform_7, window_bounds = array<i64: 16, 1>}]} {
    %c0 = arith.constant 0 : index
    %c0_0 = arith.constant 0 : index
    %0 = vector.load %arg1[%c0, %c0_0] : memref<16x640xf32, #tpu.memory_space<vmem>>, vector<16x640xf32>
    %1 = arith.truncf %0 : vector<16x640xf32> to vector<16x640xbf16>
    %c0_1 = arith.constant 0 : index
    %c0_2 = arith.constant 0 : index
    %2 = vector.load %arg2[%c0_1, %c0_2] : memref<640x64xbf16, #tpu.memory_space<vmem>>, vector<640x64xbf16>
    %cst = arith.constant dense<0.000000e+00> : vector<16x64xf32>
    %3 = tpu.matmul %1, %2, %cst {dimension_numbers = #tpu.dot_dimension_numbers<[1], [0], [0], [1], [0, 0, 1, 1], [], []>} : vector<16x640xbf16>, vector<640x64xbf16>, vector<16x64xf32> -> vector<16x64xf32>
    %c0_3 = arith.constant 0 : index
    %c0_4 = arith.constant 0 : index
    %4 = vector.load %arg3[%c0_3, %c0_4] : memref<1x64xf32, #tpu.memory_space<vmem>>, vector<1x64xf32>
    %5 = vector.broadcast %4 : vector<1x64xf32> to vector<16x64xf32>
    %6 = arith.addf %3, %5 : vector<16x64xf32>
    %cst_5 = arith.constant 0.000000e+00 : f32
    %7 = vector.broadcast %cst_5 : f32 to vector<16x64xf32>
    %8 = arith.maximumf %6, %7 : vector<16x64xf32>
    %9 = arith.truncf %8 : vector<16x64xf32> to vector<16x64xbf16>
    %c0_6 = arith.constant 0 : index
    %c0_7 = arith.constant 0 : index
    %10 = vector.load %arg4[%c0_6, %c0_7] : memref<64x32xbf16, #tpu.memory_space<vmem>>, vector<64x32xbf16>
    %cst_8 = arith.constant dense<0.000000e+00> : vector<16x32xf32>
    %11 = tpu.matmul %9, %10, %cst_8 {dimension_numbers = #tpu.dot_dimension_numbers<[1], [0], [0], [1], [0, 0, 1, 1], [], []>} : vector<16x64xbf16>, vector<64x32xbf16>, vector<16x32xf32> -> vector<16x32xf32>
    %c0_9 = arith.constant 0 : index
    %c0_10 = arith.constant 0 : index
    %12 = vector.load %arg5[%c0_9, %c0_10] : memref<1x32xf32, #tpu.memory_space<vmem>>, vector<1x32xf32>
    %13 = vector.broadcast %12 : vector<1x32xf32> to vector<16x32xf32>
    %14 = arith.addf %11, %13 : vector<16x32xf32>
    %cst_11 = arith.constant 0.000000e+00 : f32
    %15 = vector.broadcast %cst_11 : f32 to vector<16x32xf32>
    %16 = arith.maximumf %14, %15 : vector<16x32xf32>
    %c0_12 = arith.constant 0 : index
    %c0_13 = arith.constant 0 : index
    %17 = vector.load %arg6[%c0_12, %c0_13] : memref<1x32xf32, #tpu.memory_space<vmem>>, vector<1x32xf32>
    %18 = vector.broadcast %17 : vector<1x32xf32> to vector<16x32xf32>
    %19 = arith.mulf %16, %18 : vector<16x32xf32>
    %cst_14 = arith.constant dense<0.000000e+00> : vector<16xf32>
    %20 = vector.multi_reduction <add>, %19, %cst_14 [1] : vector<16x32xf32> to vector<16xf32>
    %21 = vector.shape_cast %20 : vector<16xf32> to vector<16x1xf32>
    %c0_15 = arith.constant 0 : index
    %c0_16 = arith.constant 0 : index
    %22 = vector.load %arg7[%c0_15, %c0_16] : memref<1x1xf32, #tpu.memory_space<vmem>>, vector<1x1xf32>
    %23 = vector.broadcast %22 : vector<1x1xf32> to vector<16x1xf32>
    %24 = arith.addf %21, %23 : vector<16x1xf32>
    %c0_17 = arith.constant 0 : index
    %c0_18 = arith.constant 0 : index
    %25 = vector.load %arg8[%c0_17, %c0_18] : memref<16x1xf32, #tpu.memory_space<vmem>>, vector<16x1xf32>
    tpu.vector_store %arg8[%c0_17, %c0_18], %24 {strides = array<i32>} : memref<16x1xf32, #tpu.memory_space<vmem>>, vector<16x1xf32>,
    return
  }
  func.func @transform_0(%arg0: i32) -> (i32, i32) {
    %c0_i32 = arith.constant 0 : i32
    %c0_i32_0 = arith.constant 0 : i32
    return %arg0, %c0_i32 : i32, i32
  }
  func.func @transform_1(%arg0: i32) -> (i32, i32) {
    %c0_i32 = arith.constant 0 : i32
    %c0_i32_0 = arith.constant 0 : i32
    %c0_i32_1 = arith.constant 0 : i32
    return %c0_i32, %c0_i32_0 : i32, i32
  }
  func.func @transform_2(%arg0: i32) -> (i32, i32) {
    %c0_i32 = arith.constant 0 : i32
    %c0_i32_0 = arith.constant 0 : i32
    %c0_i32_1 = arith.constant 0 : i32
    return %c0_i32, %c0_i32_0 : i32, i32
  }
  func.func @transform_3(%arg0: i32) -> (i32, i32) {
    %c0_i32 = arith.constant 0 : i32
    %c0_i32_0 = arith.constant 0 : i32
    %c0_i32_1 = arith.constant 0 : i32
    return %c0_i32, %c0_i32_0 : i32, i32
  }
  func.func @transform_4(%arg0: i32) -> (i32, i32) {
    %c0_i32 = arith.constant 0 : i32
    %c0_i32_0 = arith.constant 0 : i32
    %c0_i32_1 = arith.constant 0 : i32
    return %c0_i32, %c0_i32_0 : i32, i32
  }
  func.func @transform_5(%arg0: i32) -> (i32, i32) {
    %c0_i32 = arith.constant 0 : i32
    %c0_i32_0 = arith.constant 0 : i32
    %c0_i32_1 = arith.constant 0 : i32
    return %c0_i32, %c0_i32_0 : i32, i32
  }
  func.func @transform_6(%arg0: i32) -> (i32, i32) {
    %c0_i32 = arith.constant 0 : i32
    %c0_i32_0 = arith.constant 0 : i32
    %c0_i32_1 = arith.constant 0 : i32
    return %c0_i32, %c0_i32_0 : i32, i32
  }
  func.func @transform_7(%arg0: i32) -> (i32, i32) {
    %c0_i32 = arith.constant 0 : i32
    %c0_i32_0 = arith.constant 0 : i32
    return %arg0, %c0_i32 : i32, i32
  }
}

</mosaic_0001>

<bundles_post_ra>
// kernel: tpu_custom_call.1
= control target key start
LH: loop header
LB: loop body
LE: loop exit
PB: predicated region body
PF: predicated region fallthrough
CT: control target
= control target key end

     0   :  { %s1783_s0 = inlined_call_operand.vmem [shape: f32[20,640], index: 0, kind: input, shape index: {}]   ;;  %s1784_s1 = inlined_call_operand.vmem [shape: bf16[640,64], index: 1, kind: input, shape index: {}]   ;;  %s1785_s2 = inlined_call_operand.vmem [shape: f32[1,64], index: 2, kind: input, shape index: {}]   ;;  %s1786_s3 = inlined_call_operand.vmem [shape: bf16[64,32], index: 3, kind: input, shape index: {}]   ;;  %s1787_s4 = inlined_call_operand.vmem [shape: f32[1,32], index: 4, kind: input, shape index: {}]   ;;  %s1788_s5 = inlined_call_operand.vmem [shape: f32[1,32], index: 5, kind: input, shape index: {}]   ;;  %s1789_s6 = inlined_call_operand.<no memory space> [shape: f32[1,1], index: 6, kind: input, shape index: {}]   ;;  %s1790_s7 = inlined_call_operand.vmem [shape: f32[20,1], index: 7, kind: output, shape index: {}]  }
   0x1   :  { %v12_v0 = vstv %s1789_s6 }
   0x2   :  { %13 = vst [vmem:[#allocation2] sm:$0x1] %v12_v0 }
   0x3   :  { %s1547_s26 = smov 0   ;;  %s1549_s27 = smov 0  }
   0x4   :  { %s1551_s28 = smov 0  }
   0x5 LB: > { %s1560_s6 = sadd.s32 4294967295, %s1468_s28   ;;  %s1562_s29 = sadd.s32 1, %s1468_s28   ;;  %s1468_s28 = sphi %s1551_s28, %s1794_s28   ;;  %s1464_s27 = sphi %s1549_s27, %s1793_s27   ;;  %s1460_s26 = sphi %s1547_s26, %s1792_s26  }
   0x6   : > { %s175_s30 = ssub.s32 %s1468_s28, %s1562_s29  ;;  %s178_s8 = sadd.s32 1, %s1464_s27 }
   0x7   : > { %p176_p0 = scmp.eq.s32.totalorder %s175_s30, 0  ;;  %p188_p1 = scmp.ne.s32.totalorder %s1464_s27, %s1460_s26 }
   0x8   : > { %p189_p2 = scmp.eq.s32.totalorder %s1560_s6, 1  ;;  %p1116_p3 = scmp.ge.s32.totalorder %s1468_s28, 1 }
   0x9   : > { %s1570_s9 = scalar_select %p176_p0, %s1464_s27, %s178_s8  }
   0xa   : > { %p1572_p4 = por %p189_p2, %p188_p1  ;;  %p251_p5 = scmp.lt.s32.totalorder %s1468_s28, 3 }
   0xc   : > { %p252_p6 = pnand %p1116_p3, %p251_p5 }
   0xd   : > { %s1619_s21 = sshll.u32 (!%p252_p6), %s1560_s6, 1  ;;  %s285_s28 = sand.u32 (!%p252_p6), 1, %s1460_s26  }
   0xe   : > { %255 = sbr.rel (%p252_p6) target bundleno = 671 (0x29f), region = 48  ;;  %p294_p7 = scmp.lt.s32.totalorder (!%p252_p6), %s1619_s21, 2 }
   0xf   : > { %s1117_s30 = sshll.u32 (!%p252_p6), %s285_s28, 4 }
  0x13   : > { %v1370_v1 = vld [vmem:[%s1784_s1 + $0x78] sm:$0xff]   ;;  %v1374_v5 = vld [vmem:[%s1784_s1 + $0x70] sm:$0xff]   ;;  %v1378_v9 = vld [vmem:[%s1784_s1 + $0x68] sm:$0xff]   ;;  %s295_s18 = scalar_select %p294_p7, %s1619_s21, 2  ;;  %v1502_v37 = vmov 0.0   ;;  %vm1503_vm0 = vmmov 0  }
  0x14   : > { %v1371_v2 = vld [vmem:[%s1784_s1 + $0x38] sm:$0xff]   ;;  %1189 = vmatprep.subr.bf16.mxu0 %v1370_v1  ;;  %v1375_v6 = vld [vmem:[%s1784_s1 + $0x30] sm:$0xff]   ;;  %v1379_v10 = vld [vmem:[%s1784_s1 + $0x28] sm:$0xff]   ;;  %vm818_vm1 = vcmask 523264   ;;  %vm874_vm2 = vcmask 261120   ;;  %vm890_vm3 = vcmask 7168  }
  0x15   : > { %v1372_v3 = vld [vmem:[%s1784_s1 + $0xf8] sm:$0xff]   ;;  %1190 = vmatpush3.bf16.msra.mxu0 %v1371_v2  ;;  %v1376_v7 = vld [vmem:[%s1784_s1 + $0xf0] sm:$0xff]   ;;  %v1380_v11 = vld [vmem:[%s1784_s1 + $0xe8] sm:$0xff]   ;;  %s1279_s8 = smul.u32 40, %s295_s18  ;;  %s901_s11 = ssub.s32 (%p1572_p4), 3, %s1619_s21 }
  0x16   : > { %v1373_v4 = vld [vmem:[%s1784_s1 + $0xb8] sm:$0xff]   ;;  %1211 = vmatprep.subr.bf16.mxu1 %v1372_v3  ;;  %1191 = vmatprep.subr.bf16.mxu0 %v1374_v5  ;;  %v1377_v8 = vld [vmem:[%s1784_s1 + $0xb0] sm:$0xff]   ;;  %v1381_v12 = vld [vmem:[%s1784_s1 + $0xa8] sm:$0xff]   ;;  %s1186_s26 = sshll.u32 (%p1572_p4), %s1560_s6, 4  ;;  %p902_p8 = scmp.lt.s32.totalorder (%p1572_p4), %s901_s11, 2 }
  0x17   : > { %1212 = vmatpush3.bf16.msra.mxu1 %v1373_v4  ;;  %v1382_v13 = vld [vmem:[%s1784_s1 + $0x60] sm:$0xff]   ;;  %v1386_v17 = vld [vmem:[%s1784_s1 + $0x58] sm:$0xff]   ;;  %v1390_v21 = vld [vmem:[%s1784_s1 + $0x50] sm:$0xff]   ;;  %s1671_s22 = scalar_lea.vmem %s1783_s0, %s1279_s8  ;;  %s1738_s8 = scalar_lea.vmem [#allocation3], %s1117_s30  }
  0x18   : > { %1213 = vmatprep.subr.bf16.mxu1 %v1376_v7  ;;  %v1383_v14 = vld [vmem:[%s1784_s1 + $0x20] sm:$0xff]   ;;  %v1387_v18 = vld [vmem:[%s1784_s1 + $0x18] sm:$0xff]   ;;  %v1391_v22 = vld [vmem:[%s1784_s1 + $0x10] sm:$0xff]   ;;  %s1749_s14 = scalar_lea.vmem (%p1572_p4), %s1790_s7, %s1186_s26  }
  0x19   : > { %1192 = vmatpush3.bf16.msra.mxu0 %v1375_v6  ;;  %v1384_v15 = vld [vmem:[%s1784_s1 + $0xe0] sm:$0xff]   ;;  %v1388_v19 = vld [vmem:[%s1784_s1 + $0xd8] sm:$0xff]   ;;  %v1392_v23 = vld [vmem:[%s1784_s1 + $0xd0] sm:$0xff]  }
  0x1a   : > { %1193 = vmatprep.subr.bf16.mxu0 %v1378_v9  ;;  %v1385_v16 = vld [vmem:[%s1784_s1 + $0xa0] sm:$0xff]   ;;  %v1389_v20 = vld [vmem:[%s1784_s1 + $0x98] sm:$0xff]   ;;  %v1393_v24 = vld [vmem:[%s1784_s1 + $0x90] sm:$0xff]  }
  0x1b   : > { %1214 = vmatpush3.bf16.msra.mxu1 %v1377_v8  ;;  %v1394_v25 = vld [vmem:[%s1784_s1 + $0x48] sm:$0xff]   ;;  %v1398_v29 = vld [vmem:[%s1784_s1 + $0x40] sm:$0xff]   ;;  %v317_v33 = vld [vmem:[%s1671_s22 + $0x30] sm:$0xff] }
  0x1c   : > { %1215 = vmatprep.subr.bf16.mxu1 %v1380_v11  ;;  %v1395_v26 = vld [vmem:[%s1784_s1 + $0x8] sm:$0xff]   ;;  %v1399_v30 = vld [vmem:[%s1784_s1] sm:$0xff]   ;;  %v314_v39 = vld [vmem:[%s1671_s22 + $0x18] sm:$0xff] }
  0x1d   : > { %1194 = vmatpush3.bf16.msra.mxu0 %v1379_v10  ;;  %v1396_v27 = vld [vmem:[%s1784_s1 + $0xc8] sm:$0xff]   ;;  %v1400_v31 = vld [vmem:[%s1784_s1 + $0xc0] sm:$0xff]   ;;  %v1402_v43 = vld [vmem:[%s1784_s1 + $0x138] sm:$0xff]  }
  0x1e   : > { %1195 = vmatprep.subr.bf16.mxu0 %v1382_v13  ;;  %v1397_v28 = vld [vmem:[%s1784_s1 + $0x88] sm:$0xff]   ;;  %v1401_v35 = vld [vmem:[%s1784_s1 + $0x80] sm:$0xff]   ;;  %v313_v44 = vld [vmem:[%s1671_s22 + $0x10] sm:$0xff] }
  0x1f   : > { %1216 = vmatpush3.bf16.msra.mxu1 %v1381_v12  ;;  %v312_v32 = vld [vmem:[%s1671_s22 + $0x8] sm:$0xff]  ;;  %v311_v36 = vld [vmem:[%s1671_s22] sm:$0xff]  ;;  %v318_v45 = vld [vmem:[%s1671_s22 + $0x38] sm:$0xff] }
  0x20   : > { %1217 = vmatprep.subr.bf16.mxu1 %v1384_v15  ;;  %v322_v34 = vpack.c.bf16 %v317_v33, %v312_v32  ;;  %v316_v38 = vld [vmem:[%s1671_s22 + $0x28] sm:$0xff]  ;;  %v319_v40 = vld [vmem:[%s1671_s22 + $0x40] sm:$0xff]  ;;  %v323_v46 = vpack.c.bf16 %v318_v45, %v313_v44  ;;  %v1403_v47 = vld [vmem:[%s1784_s1 + $0x130] sm:$0xff]  }
  0x21   : > { %1196 = vmatpush3.bf16.msra.mxu0 %v1383_v14  ;;  %v321_v41 = vpack.c.bf16 %v316_v38, %v311_v36  ;;  %v324_v42 = vpack.c.bf16 %v319_v40, %v314_v39  ;;  %v1404_v48 = vld [vmem:[%s1784_s1 + $0x128] sm:$0xff]   ;;  %v1405_v49 = vld [vmem:[%s1784_s1 + $0x120] sm:$0xff]   ;;  %v1406_v50 = vld [vmem:[%s1784_s1 + $0x118] sm:$0xff]  }
  0x22   : > { %1197 = vmatprep.subr.bf16.mxu0 %v1386_v17  ;;  %685 = vmatprep.mubr.bf16.mxu0 %v322_v34  ;;  %v1407_v51 = vld [vmem:[%s1784_s1 + $0x110] sm:$0xff]   ;;  %v1408_v52 = vld [vmem:[%s1784_s1 + $0x108] sm:$0xff]   ;;  %v1409_v53 = vld [vmem:[%s1784_s1 + $0x100] sm:$0xff]  }
  0x23   : > { %1218 = vmatpush3.bf16.msra.mxu1 %v1385_v16  ;;  %726 = vmatprep.mubr.bf16.mxu1 %v324_v42  ;;  %v315_v54 = vld [vmem:[%s1671_s22 + $0x20] sm:$0xff]  ;;  %v320_v55 = vld [vmem:[%s1671_s22 + $0x48] sm:$0xff]  ;;  %v1410_v57 = vld [vmem:[%s1786_s3 + $0x18] sm:$0xff]  }
  0x24   : > { %1219 = vmatprep.subr.bf16.mxu1 %v1388_v19  ;;  %v325_v56 = vpack.c.bf16 %v320_v55, %v315_v54  ;;  %v1411_v58 = vld [vmem:[%s1786_s3 + $0x10] sm:$0xff]   ;;  %v1412_v59 = vld [vmem:[%s1786_s3 + $0x8] sm:$0xff]   ;;  %v1413_v60 = vld [vmem:[%s1786_s3] sm:$0xff]  }
  0x25   : > { %1198 = vmatpush3.bf16.msra.mxu0 %v1387_v18  ;;  %v1120_v5 = vld [vmem:[%s1785_s2] ss:$0 sm:$0xff] }
  0x26   : > { %1199 = vmatprep.subr.bf16.mxu0 %v1390_v21 }
  0x27   : > { %1220 = vmatpush3.bf16.msra.mxu1 %v1389_v20 }
  0x28   : > { %1221 = vmatprep.subr.bf16.mxu1 %v1392_v23  ;;  %v1161_v23 = vld [vmem:[%s1787_s4] ss:$0 sm:$0xff] }
  0x29   : > { %1200 = vmatpush3.bf16.msra.mxu0 %v1391_v22 }
  0x2a   : > { %1201 = vmatprep.subr.bf16.mxu0 %v1394_v25 }
  0x2b   : > { %1222 = vmatpush3.bf16.msra.mxu1 %v1393_v24 }
  0x2c   : > { %1223 = vmatprep.subr.bf16.mxu1 %v1396_v27  ;;  %v1167_v27 = vld [vmem:[%s1788_s5] ss:$0 sm:$0xff] }
  0x2d   : > { %1202 = vmatpush3.bf16.msra.mxu0 %v1395_v26 }
  0x2e   : > { %1203 = vmatprep.subr.bf16.mxu0 %v1398_v29 }
  0x2f   : > { %1224 = vmatpush3.bf16.msra.mxu1 %v1397_v28 }
  0x30   : > { %1225 = vmatprep.subr.bf16.mxu1 %v1400_v31 }
  0x31   : > { %1204 = vmatpush3.bf16.msra.mxu0 %v1399_v30 }
  0x32   : > { %1247 = vmatprep.subr.bf16.mxu0 %v1502_v37 }
  0x33   : > { %1226 = vmatpush3.bf16.msra.mxu1 %v1401_v35 }
  0x34   : > { %1267 = vmatprep.subr.bf16.mxu1 %v1502_v37  ;;  %686 = vmatmul.mubr.bf16.vlgmr.msra.gmra.mxu0 %v321_v41 }
  0x35   : > { %1248 = vmatpush3.bf16.msra.mxu0 %v1402_v43  ;;  %1263 = vmatprep.mubr.msk.bf16.mxu0 %vm1503_vm0, %v1502_v37 }
  0x36   : > { %727 = vmatmul.mubr.bf16.vlgmr.msra.gmra.mxu1 %v323_v46  ;;  %1249 = vmatprep.subr.bf16.mxu0 %v1502_v37 }
  0x37   : > { %1275 = vmatprep.mubr.msk.bf16.mxu1 %vm1503_vm0, %v1502_v37  ;;  %1268 = vmatpush3.bf16.msra.mxu1 %v1410_v57 }
  0x38   : > { %1269 = vmatprep.subr.bf16.mxu1 %v1502_v37 }
  0x39   : > { %1250 = vmatpush3.bf16.msra.mxu0 %v1403_v47 }
  0x3a   : > { %1251 = vmatprep.subr.bf16.mxu0 %v1502_v37 }
  0x3b   : > { %1270 = vmatpush3.bf16.msra.mxu1 %v1411_v58 }
  0x3c   : > { %1271 = vmatprep.subr.bf16.mxu1 %v1502_v37 }
  0x3d   : > { %1252 = vmatpush3.bf16.msra.mxu0 %v1404_v48 }
  0x3e   : > { %1253 = vmatprep.subr.bf16.mxu0 %v1502_v37 }
  0x3f   : > { %1272 = vmatpush3.bf16.msra.mxu1 %v1412_v59 }
  0x40   : > { %1273 = vmatprep.subr.bf16.mxu1 %v1502_v37 }
  0x41   : > { %1254 = vmatpush3.bf16.msra.mxu0 %v1405_v49 }
  0x42   : > { %1255 = vmatprep.subr.bf16.mxu0 %v1502_v37 }
  0x43   : > { %1274 = vmatpush3.bf16.msra.mxu1 %v1413_v60 }
  0x45   : > { %1256 = vmatpush3.bf16.msra.mxu0 %v1406_v50 }
  0x46   : > { %1257 = vmatprep.subr.bf16.mxu0 %v1502_v37 }
  0x49   : > { %1258 = vmatpush3.bf16.msra.mxu0 %v1407_v51 }
  0x4a   : > { %1259 = vmatprep.subr.bf16.mxu0 %v1502_v37 }
  0x4d   : > { %1260 = vmatpush3.bf16.msra.mxu0 %v1408_v52 }
  0x4e   : > { %1261 = vmatprep.subr.bf16.mxu0 %v1502_v37  ;;  %v1168_v37 = vld [vmem:[#allocation2] ss:$0 sm:$0xff] }
  0x51   : > { %1262 = vmatpush3.bf16.msra.mxu0 %v1409_v53 }
  0x54   : > { %1264 = vmatmul.mubr.bf16.vlgmr.msra.gmra.mxu0 %v325_v56 }
  0xf4   : > { %v1205_v61 = vpop.f32.mrf.mxu0 }
  0xf6   : > { %v1206_v62 = vpop.f32.mrf.mxu0  ;;  %v1227_v63 = vpop.f32.mrf.mxu1 }
  0xf7   : > { %v1207_v4 = vadd.f32 %v1206_v62, %v1205_v61 }
  0xf8   : > { %v1208_v0 = vpop.f32.mrf.mxu0  ;;  %v1228_v1 = vpop.f32.mrf.mxu1 }
  0xf9   : > { %v688_v8 = vadd.f32 %v1207_v4, %v1120_v5  ;;  %v1229_v9 = vadd.f32 %v1228_v1, %v1227_v63 }
  0xfa   : > { %v1209_v2 = vpop.f32.mrf.mxu0  ;;  %v1230_v3 = vpop.f32.mrf.mxu1 }
  0xfb   : > { %v1210_v6 = vadd.f32 %v1209_v2, %v1208_v0  ;;  %v729_v13 = vadd.f32 %v1229_v9, %v688_v8 }
  0xfc   : > { %v1231_v7 = vpop.f32.mrf.mxu1 }
  0xfd   : > { %v691_v10 = vadd.f32 %v1210_v6, %v1120_v5  ;;  %v1232_v11 = vadd.f32 %v1231_v7, %v1230_v3 }
  0xff   : > { %v732_v16 = vadd.f32 %v1232_v11, %v691_v10 }
 0x114   : > { %v769_v12 = vpop.f32.mrf.mxu0 }
 0x115   : > { %v770_v15 = vadd.f32 %v769_v12, %v729_v13 }
 0x116   : > { %v1265_v14 = vpop.f32.mrf.mxu0 }
 0x117   : > { %v776_v20 = vmax.f32 %v770_v15, 0.0 }
 0x118   : > { %v772_v17 = vpop.f32.mrf.mxu0 }
 0x119   : > { %v773_v18 = vadd.f32 %v772_v17, %v732_v16 }
 0x11a   : > { %v1266_v19 = vpop.f32.mrf.mxu0 }
 0x11b   : > { %v777_v21 = vmax.f32 %v773_v18, 0.0 }
 0x11d   : > { %v778_v22 = vpack.c.bf16 %v777_v21, %v776_v20 }
 0x11f   : > { %1276 = vmatmul.mubr.msk.bf16.vlgmr.msra.gmra.mxu1 %vm818_vm1, %v778_v22 }
 0x1df   : > { %v856_v24 = vpop.f32.mrf.mxu1 }
 0x1e0   : > { %v857_v25 = vadd.f32 %v1161_v23, %v856_v24 }
 0x1e1   : > { %v1277_v26 = vpop.f32.mrf.mxu1 }
 0x1e2   : > { %v863_v28 = vmax.f32 %v857_v25, 0.0 }
 0x1e3   : > { %v859_v29 = vpop.f32.mrf.mxu1 }
 0x1e4   : > { %v860_v30 = vadd.f32 %v1161_v23, %v859_v29  ;;  %v872_v31 = vmul.f32 %v1167_v27, %v863_v28 }
 0x1e5   : > { %v1278_v32 = vpop.f32.mrf.mxu1 }
 0x1e6   : > { %v864_v33 = vmax.f32 %v860_v30, 0.0  ;;  %v875_v34 = vsel %vm874_vm2, %v872_v31, 0.0 }
 0x1e7   : > { %876 = vadd.xlane.f32.xlu0 %v875_v34 }
 0x1e8   : > { %v873_v35 = vmul.f32 %v1167_v27, %v864_v33 }
 0x1ea   : > { %v878_v36 = vsel %vm874_vm2, %v873_v35, 0.0 }
 0x1eb   : > { %879 = vadd.xlane.f32.xlu0 %v878_v36 }
 0x270   : > { %v877_v38 = vpop.xlane.xlu0 %876 }
 0x271   : > { %v888_v39 = vadd.f32 %v1168_v37, %v877_v38 }
 0x273   : > { %891 = vst.msk [vmem:[%s1738_s8] sm:$0xff] %vm890_vm3, %v888_v39  ;;  %899 = sbr.rel (!%p1572_p4) target bundleno = 671 (0x29f), region = 52 }
 0x274   : > { %v880_v40 = vpop.xlane.xlu0 %879 }
 0x275   : > { %v889_v41 = vadd.f32 %v1168_v37, %v880_v40 }
 0x277   : > { %892 = vst.msk [vmem:[%s1738_s8 + $0x8] sm:$0xff] %vm890_vm3, %v889_v41 }
 0x278   : > { %s1796_s11 = smov (!%p902_p8, %s901_s11), 2 }
 0x279   : > { %s1171_s15 = sshll.u32 %s1796_s11, 7 }
 0x27a   : > { %p1174_p9 = scmp.eq.s32.totalorder %s1171_s15, 0 }
 0x27b   : > { %s1755_s16 = sshrl.u32 (!%p1174_p9), %s1796_s11, 1 }
 0x27c   : > { %910 = sbr.rel (%p1174_p9) target bundleno = 671 (0x29f), region = 56  ;;  %p1175_p10 = scmp.le.s32.totalorder (!%p1174_p9), %s1755_s16, 0 }
 0x281   : > { %1069 = sbr.rel (%p1175_p10) target bundleno = 654 (0x28e), region = 132  ;;  %s1470_s6 = smov (!%p1175_p10), %s1749_s14  }
 0x282   : > { %s1474_s10 = smov (!%p1175_p10), %s1738_s8   ;;  %s1478_s21 = smov (!%p1175_p10), 0  }
 0x283   : > { %s1482_s22 = smov (!%p1175_p10), 0  }
 0x286 LB: >> { %v975_v42 = vld [vmem:[%s1476_s10] sm:$0xff]  ;;  %v977_v43 = vld [vmem:[%s1476_s10 + $0x8] sm:$0xff]  ;;  %s979_s17 = sadd.s32 1, %s1480_s21  ;;  %s969_s22 = sadd.s32 1, %s1484_s22   ;;  %s1484_s22 = sphi %s1482_s22, %s969_s22   ;;  %s1480_s21 = sphi %s1478_s21, %s1479_s21   ;;  %s1476_s10 = sphi %s1474_s10, %s984_s10   ;;  %s1472_s6 = sphi %s1470_s6, %s985_s6  }
 0x287   : >> { %976 = vst [vmem:[%s1472_s6] sm:$0xff] %v975_v42  ;;  %978 = vst [vmem:[%s1472_s6 + $0x8] sm:$0xff] %v977_v43  ;;  %p980_p11 = scmp.ge.s32.totalorder %s979_s17, %s1755_s16  ;;  %p968_p12 = scmp.ge.s32.totalorder %s969_s22, %s1755_s16 }
 0x289   : >> { %s1798_s17 = smov (%p980_p11, %s979_s17), 0  ;;  %971 = sbr.rel (!%p968_p12) target bundleno = 646 (0x286), region = 138 }
 0x28a   : >> { %s1176_s19 = sshll.u32 %s1798_s17, 4  ;;  %s1479_s21 = smov %s1798_s17  }
 0x28b   : >> { %s984_s10 = scalar_lea.vmem %s1738_s8, %s1176_s19 [#allocation3]   ;;  %s985_s6 = scalar_lea.vmem %s1749_s14, %s1176_s19  }
 0x28e PF: > { %s1765_s18 = sand.u32 1, %s1796_s11   ;;  %s1187_s20 = sshll.u32 %s1755_s16, 4 }
 0x28f   : > { %s990_s23 = scalar_lea.vmem %s1738_s8, %s1187_s20 [#allocation3]   ;;  %s992_s24 = scalar_lea.vmem %s1749_s14, %s1187_s20  }
 0x290   : > { %p1181_p13 = scmp.le.s32.totalorder %s1765_s18, 0 }
 0x291   : > { %s1486_s25 = smov (!%p1181_p13), %s992_s24   ;;  %s1490_s28 = smov (!%p1181_p13), %s990_s23  }
 0x292   : > { %1083 = sbr.rel (%p1181_p13) target bundleno = 671 (0x29f), region = 143  ;;  %s1494_s30 = smov (!%p1181_p13), 0  }
 0x293   : > { %s1498_s26 = smov (!%p1181_p13), 0  }
 0x297 LB: >> { %v1002_v44 = vld [vmem:[%s1492_s28] sm:$0xff]  ;;  %s1004_s11 = sadd.s32 1, %s1496_s30  ;;  %s996_s26 = sadd.s32 1, %s1500_s26   ;;  %s1500_s26 = sphi %s1498_s26, %s996_s26   ;;  %s1496_s30 = sphi %s1494_s30, %s1495_s30   ;;  %s1492_s28 = sphi %s1490_s28, %s1009_s28   ;;  %s1488_s25 = sphi %s1486_s25, %s1010_s25  }
 0x298   : >> { %1003 = vst [vmem:[%s1488_s25] sm:$0xff] %v1002_v44  ;;  %p1005_p0 = scmp.ge.s32.totalorder %s1004_s11, %s1765_s18  ;;  %p995_p1 = scmp.ge.s32.totalorder %s996_s26, %s1765_s18 }
 0x29a   : >> { %s1800_s11 = smov (%p1005_p0, %s1004_s11), 0  ;;  %998 = sbr.rel (!%p995_p1) target bundleno = 663 (0x297), region = 149 }
 0x29b   : >> { %s1182_s8 = sshll.u32 %s1800_s11, 3  ;;  %s1495_s30 = smov %s1800_s11  }
 0x29c   : >> { %s1009_s28 = scalar_lea.vmem %s990_s23, %s1182_s8 [#allocation3]   ;;  %s1010_s25 = scalar_lea.vmem %s992_s24, %s1182_s8  }
 0x29f PF: > { %p16_p2 = scmp.ge.s32.totalorder %s1562_s29, 4   ;;  %s1792_s26 = smov %s1464_s27 }
 0x2a0   : > { %s1793_s27 = smov %s1570_s9  ;;  %s1794_s28 = smov %s1562_s29 }
 0x2a1   :  { %18 = sbr.rel (!%p16_p2) target bundleno = 5 (0x5), region = 160 }

</bundles_post_ra>
